<compile_context>
chip_gen: v7x
topology: tpu7x:2x2x1
jax: 0.10.0
libtpu: 0.0.40
codegen_flags: <defaults>
</compile_context>

<pallas_src>
import numpy as np

import jax
import jax.numpy as jnp
from jax.experimental import pallas as pl
from jax.experimental.pallas import tpu as pltpu


def _make_landmark_loss_kernel(inv_norm):
    """Build the kernel with the 1/(B*L) factor baked in as a scalar constant."""

    def kernel(inp_ref, tgt_ref, w_ref, out_ref):
        # inp_ref/tgt_ref: (B, 2L) f32 VMEM; w_ref: (1, 2L) f32 VMEM.
        diff = inp_ref[...] - tgt_ref[...]                     # (B, 2L)
        # Reduce the batch (sublane) axis first so the weighted multiply only
        # touches 2L lanes instead of a (B, 2L) broadcast of w.
        s = jnp.sum(diff * diff, axis=0, keepdims=True)        # (1, 2L)
        out_ref[0] = jnp.sum(s * w_ref[...]) * inv_norm        # scalar to SMEM

    return kernel


def _landmark_loss_call(inp, target, w_flat):
    """inp, target: (B, L, D) f32; w_flat: (1, L*D) f32 (cached) -> scalar f32."""
    B, L, D = inp.shape
    # Lane-dense flatten (interleaved [x0, y0, x1, y1, ...]); under jit these
    # are layout-preserving bitcasts, not data movement.
    inp_flat = inp.reshape(B, L * D)
    tgt_flat = target.reshape(B, L * D)

    n = B * L * D
    kernel = _make_landmark_loss_kernel(1.0 / (B * L))

    out = pl.pallas_call(
        kernel,
        out_shape=jax.ShapeDtypeStruct((1,), jnp.float32),
        in_specs=[
            pl.BlockSpec(memory_space=pltpu.VMEM),
            pl.BlockSpec(memory_space=pltpu.VMEM),
            pl.BlockSpec(memory_space=pltpu.VMEM),
        ],
        out_specs=pl.BlockSpec(memory_space=pltpu.SMEM),
        cost_estimate=pl.CostEstimate(
            flops=3 * n + 2 * L * D + 1,
            transcendentals=0,
            bytes_accessed=4 * (2 * n + L * D + 1),
        ),
    )(inp_flat, tgt_flat, w_flat)
    return out[0]


class LandmarkLoss:
    """Pallas-TPU port of the PyTorch LandmarkLoss module."""

    def __init__(self, weight=None):
        if weight is None:
            # Deterministic init matching the module's __init__:
            #   ones(68), weight[28:31] = 20, weight[-8:] = 20, expand_dims(0)
            w = np.ones([68], dtype=np.float32)
            w[28:31] = 20.0
            w[-8:] = 20.0
            weight = np.expand_dims(w, 0)
        weight = np.asarray(weight, dtype=np.float32)
        if weight.ndim == 1:
            weight = weight[None, :]
        # Precompute the lane-dense (1, 2L) weight ONCE (repeated per x/y coord
        # so it lines up with the (B, L, 2) -> (B, 2L) interleaved flatten).
        self._w_flat = jnp.asarray(np.repeat(weight, 2, axis=-1))  # (1, 2L)
        self._loss_fn = jax.jit(_landmark_loss_call)

    def __call__(self, inp, target):
        return self._loss_fn(inp, target, self._w_flat)


if __name__ == "__main__":
    key = jax.random.PRNGKey(0)
    k1, k2 = jax.random.split(key)

    B, L, D = 2, 68, 2
    inp = jax.random.normal(k1, (B, L, D), dtype=jnp.float32)
    target = jax.random.normal(k2, (B, L, D), dtype=jnp.float32)

    module = LandmarkLoss()
    loss = module(inp, target)
    loss = jax.block_until_ready(loss)

    # Pure-JAX reference check (mirrors the PyTorch forward).
    w_ref = jnp.ones((1, L), dtype=jnp.float32)
    w_ref = w_ref.at[0, 28:31].set(20.0).at[0, -8:].set(20.0)
    ref = jnp.sum(jnp.sum((inp - target) ** 2, axis=-1) * w_ref) / (B * L)
    assert jnp.allclose(loss, ref, rtol=1e-5, atol=1e-5), (loss, ref)

    print("KERNEL_OK")
</pallas_src>

<mosaic_0001>
module attributes {stable_mosaic.version = 11 : i64} {
  func.func @kernel(%arg0: memref<2x136xf32, #tpu.memory_space<vmem>>, %arg1: memref<2x136xf32, #tpu.memory_space<vmem>>, %arg2: memref<1x136xf32, #tpu.memory_space<vmem>>, %arg3: memref<1xf32, #tpu.memory_space<smem>>) attributes {dimension_semantics = [], scalar_prefetch = 0 : i64, scratch_operands = 0 : i64, tpu.core_type = #tpu.core_type<tc>} {
    %c0 = arith.constant 0 : index
    %c0_0 = arith.constant 0 : index
    %0 = vector.load %arg0[%c0, %c0_0] : memref<2x136xf32, #tpu.memory_space<vmem>>, vector<2x136xf32>
    %c0_1 = arith.constant 0 : index
    %c0_2 = arith.constant 0 : index
    %1 = vector.load %arg1[%c0_1, %c0_2] : memref<2x136xf32, #tpu.memory_space<vmem>>, vector<2x136xf32>
    %2 = arith.subf %0, %1 : vector<2x136xf32>
    %3 = arith.mulf %2, %2 : vector<2x136xf32>
    %cst = arith.constant dense<0.000000e+00> : vector<136xf32>
    %4 = vector.multi_reduction <add>, %3, %cst [0] : vector<2x136xf32> to vector<136xf32>
    %5 = vector.shape_cast %4 : vector<136xf32> to vector<1x136xf32>
    %c0_3 = arith.constant 0 : index
    %c0_4 = arith.constant 0 : index
    %6 = vector.load %arg2[%c0_3, %c0_4] : memref<1x136xf32, #tpu.memory_space<vmem>>, vector<1x136xf32>
    %7 = arith.mulf %5, %6 : vector<1x136xf32>
    %8 = vector.shape_cast %7 : vector<1x136xf32> to vector<1x1x136xf32>
    %cst_5 = arith.constant dense<0.000000e+00> : vector<1xf32>
    %9 = vector.multi_reduction <add>, %8, %cst_5 [1, 2] : vector<1x1x136xf32> to vector<1xf32>
    %10 = vector.shape_cast %9 : vector<1xf32> to vector<1x1x1xf32>
    %11 = vector.extract %10[0, 0, 0] : f32 from vector<1x1x1xf32>
    %cst_6 = arith.constant 0.0073529412 : f32
    %12 = arith.mulf %11, %cst_6 : f32
    %c0_7 = arith.constant 0 : index
    %13 = memref.load %arg3[%c0_7] : memref<1xf32, #tpu.memory_space<smem>>
    memref.store %12, %arg3[%c0_7] : memref<1xf32, #tpu.memory_space<smem>>
    return
  }
}

</mosaic_0001>

<bundles_post_ra>
// kernel: _landmark_loss_call.1
= control target key start
LH: loop header
LB: loop body
LE: loop exit
PB: predicated region body
PF: predicated region fallthrough
CT: control target
= control target key end

     0   :  { %v23_v2 = vlaneseq  ;;  %v106_v4 = vmov 1983009808   ;;  %s149_s0 = inlined_call_operand.vmem [shape: f32[2,136], index: 0, kind: input, shape index: {}]   ;;  %s150_s1 = inlined_call_operand.vmem [shape: f32[2,136], index: 1, kind: input, shape index: {}]   ;;  %s151_s2 = inlined_call_operand.vmem [shape: f32[1,136], index: 2, kind: input, shape index: {}]   ;;  %s152_s3 = inlined_call_operand.hbm [shape: f32[1], index: 3, kind: output, shape index: {}]  }
   0x1   :  { %v15_v0 = vld [vmem:[%s149_s0] sm:$0xf]  ;;  %v21_v5 = vunpack.c.l.s4 %v106_v4 }
   0x2   :  { %v16_v1 = vld [vmem:[%s150_s1] sm:$0xf] }
   0x3   :  { %v17_v3 = vsub.f32 %v15_v0, %v16_v1 }
   0x4   :  { %8 = vsyncpa [#allocation3], 0  ;;  %v24_v6 = vshrl.u32 %v23_v2, 7  ;;  %v22_v8 = vunpack.c.0.s8 %v21_v5  ;;  %vm30_vm0 = vcmask 1041408   ;;  %vm38_vm1 = vcmask 58368   ;;  %s94_s19 = scalar_lea.hbm %s152_s3, 16 }
   0x5   :  { %v18_v7 = vmul.f32 %v17_v3, %v17_v3  ;;  %v46_v20 = vld [vmem:[%s151_s2] sm:$0x3]  ;;  %vm60_vm2 = vcmask 1040384   ;;  %vm62_vm3 = vcmask 57344   ;;  %p95_p0 = scmp.ne.s32.totalorder %s152_s3, %s94_s19  ;;  %p98_p1 = scmp.lt.u32.totalorder %s94_s19, %s152_s3 }
   0x6   :  { %v25_v9 = vsub.s32 %v22_v8, %v24_v6  ;;  %v50_v19 = vsub.s32 0, %v24_v6  ;;  %v54_v23 = vsub.s32 1, %v24_v6 }
   0x7   :  { %p100_p2 = pnand %p98_p1, %p95_p0 }
   0x8   :  { %v26_v10 = vrot.slane %v18_v7, %v25_v9  ;;  %v51_v26 = vrot.slane %v46_v20, %v50_v19  ;;  %v55_v29 = vrot.slane %v46_v20, %v54_v23 }
   0xa   :  { %v27_v11 = vcombine.high %v26_v10, %v26_v10  ;;  %v31_v12 = vsel %vm30_vm0, %v26_v10, 0.0 }
   0xb   :  { %v32_v13 = vrot.slane %v31_v12, 4 }
   0xc   :  { %v39_v14 = vsel %vm38_vm1, %v27_v11, 0.0 }
   0xd   :  { %v33_v15 = vadd.f32 %v32_v13, %v31_v12  ;;  %v40_v16 = vrot.slane %v39_v14, 4 }
   0xf   :  { %v34_v17 = vrot.slane %v33_v15, 2  ;;  %v41_v18 = vadd.f32 %v40_v16, %v39_v14 }
  0x11   :  { %v35_v21 = vadd.f32 %v34_v17, %v33_v15  ;;  %v42_v22 = vrot.slane %v41_v18, 2 }
  0x13   :  { %v36_v24 = vrot.slane %v35_v21, 1  ;;  %v43_v25 = vadd.f32 %v42_v22, %v41_v18 }
  0x15   :  { %v37_v27 = vadd.f32 %v36_v24, %v35_v21  ;;  %v44_v28 = vrot.slane %v43_v25, 1 }
  0x17   :  { %v45_v30 = vadd.f32 %v44_v28, %v43_v25  ;;  %v58_v31 = vmul.f32 %v51_v26, %v37_v27 }
  0x19   :  { %v59_v32 = vmul.f32 %v55_v29, %v45_v30  ;;  %v61_v33 = vsel %vm60_vm2, %v58_v31, 0.0 }
  0x1b   :  { %v63_v34 = vsel %vm62_vm3, %v59_v32, 0.0 }
  0x1c   :  { %v64_v35 = vadd.f32 %v63_v34, %v61_v33 }
  0x1e   :  { %65 = vadd.xlane.f32.xlu0 %v64_v35 }
  0xab   :  { %v66_v36 = vpop.xlane.xlu0 %65 }
  0xac   :  { %v67_v37 = vrot.slane %v66_v36, 4 }
  0xae   :  { %v68_v38 = vadd.f32 %v67_v37, %v66_v36 }
  0xb0   :  { %v69_v39 = vrot.slane %v68_v38, 2 }
  0xb2   :  { %v70_v40 = vadd.f32 %v69_v39, %v68_v38 }
  0xb4   :  { %v71_v41 = vrot.slane %v70_v40, 1 }
  0xb6   :  { %v72_v42 = vadd.f32 %v71_v41, %v70_v40 }
  0xb8   :  { %90 = vpush %v72_v42 }
  0xe9   :  { %s91_s2 = spop %90 }
  0xea   :  { %s74_s16 = smul.f32 0.007352941, %s91_s2 }
  0xec   :  { %76 = sst [smem:[#allocation2]] %s74_s16 }
  0xed   :  { %103 = shalt.err (!%p100_p2)
}
  0xee   :  { %s107_s24 = smov [#allocation2]  }
  0xef   :  { %84 = dma.smem_to_hbm %s107_s24, 16, %s152_s3, [#allocation3]  }
  0xf0   :  { %104 = dma.done.wait [#allocation3], 16  }
  0xf1   :  { %105 = vsyncadd [#allocation3], 4294967280 }
  0xf2   :  { %88 = sfence }
  0xf3   :  { %89 = vsyncpa [#allocation3], 1 }

</bundles_post_ra>
